<compile_context>
chip_gen: v6e
topology: v6e:2x2x1
jax: 0.10.0
libtpu: 0.0.40
codegen_flags: <defaults>
</compile_context>

<pallas_src>
import math
from functools import partial

import jax
import jax.numpy as jnp
from jax.experimental import pallas as pl
from jax.experimental.pallas import tpu as pltpu

EPS = 1e-5  # torch.nn.LayerNorm default eps


def _layernorm(x, g, b):
    mu = jnp.mean(x, axis=-1, keepdims=True)
    var = jnp.mean((x - mu) ** 2, axis=-1, keepdims=True)
    return (x - mu) * jax.lax.rsqrt(var + EPS) * g + b


def _gelu_tanh(x):
    # TODO(synk): torch.nn.GELU() defaults to the erf form; the tanh (GPT-2
    # "new gelu") approximation is used since erf lowering in Mosaic is not
    # guaranteed.  The in-script reference uses the same form.
    c = math.sqrt(2.0 / math.pi)
    return 0.5 * x * (1.0 + jnp.tanh(c * (x + 0.044715 * x * x * x)))


def transformer_block_kernel(
    x_ref,                       # (tile_m, C) token rows (whole sequences)
    w_qkv_ref, b_qkv_ref,        # attn.c_attn   (C, 3C), (1, 3C)
    w_o_ref, b_o_ref,            # attn.c_proj   (C, C),  (1, C)
    g1_ref, beta1_ref,           # ln_1          (1, C)
    w_fc_ref, b_fc_ref,          # mlp.c_fc      (C, 4C), (1, 4C)
    w_pr_ref, b_pr_ref,          # mlp.c_proj    (4C, C), (1, C)
    g2_ref, beta2_ref,           # ln_2          (1, C)
    o_ref,                       # (tile_m, C)
    *, num_heads, seq_len, approx_recip):
    M, C = x_ref.shape
    T = seq_len
    gb = M // T                  # whole sequences in this tile
    hd = C // num_heads
    scale = 1.0 / math.sqrt(hd)
    mm = w_qkv_ref.dtype         # MXU operand dtype (bf16 by default)

    x2 = x_ref[...].astype(jnp.float32)     # residual/LN math stays f32

    # ------------------------- causal self-attention -------------------------
    qkv = jnp.dot(x2.astype(mm), w_qkv_ref[...],
                  preferred_element_type=jnp.float32) + b_qkv_ref[...]
    q, k, v = qkv[:, 0:C], qkv[:, C:2 * C], qkv[:, 2 * C:3 * C]
    w_o = w_o_ref[...]

    row = jax.lax.broadcasted_iota(jnp.int32, (T, T), 0)
    col = jax.lax.broadcasted_iota(jnp.int32, (T, T), 1)
    causal = (col <= row)[None, :, :]       # (1, T, T) lower-triangular
    neg = jnp.float32(-1e30)                # finite mask value (NaN-safe)

    # Each head's context is folded straight into the output projection:
    #   a = sum_h softmax(q_h k_h^T / sqrt(hd)) v_h @ W_o[h*hd:(h+1)*hd, :]
    # (no (M, C) scratch, no masked per-head stores; the merge is MXU work).
    a = jnp.zeros((M, C), jnp.float32)
    # TODO(synk): at num_heads >= 12 switch to lax.fori_loop(..., unroll=True)
    # to bound live ranges; at T >= 512 switch to a flash-style KV-tiled loop
    # (the (gb, T, T) scores are quadratic VMEM and won't fit v7x's 64 MiB).
    for h in range(num_heads):               # static unroll (num_heads = 4)
        sl = slice(h * hd, (h + 1) * hd)
        # 8-wide lane slices at this toy hd (masked/relayout); lane-aligned
        # once hd is a multiple of 128 at real model sizes.
        qh = q[:, sl].reshape(gb, T, hd)
        kh = k[:, sl].reshape(gb, T, hd)
        vh = v[:, sl].reshape(gb, T, hd)
        s = jnp.einsum('btd,bsd->bts', qh, kh,
                       preferred_element_type=jnp.float32) * scale
        s = jnp.where(causal, s, neg)
        s = s - jnp.max(s, axis=-1, keepdims=True)
        p = jnp.exp(s)
        denom = jnp.sum(p, axis=-1, keepdims=True)
        oh = jnp.einsum('bts,bsd->btd', p, vh,
                        preferred_element_type=jnp.float32)
        if approx_recip:
            oh = oh * pl.reciprocal(denom, approx=True)   # EUP slot
        else:
            oh = oh / denom
        a = a + jnp.dot(oh.reshape(M, hd).astype(mm), w_o[sl, :],
                        preferred_element_type=jnp.float32)
    a = a + b_o_ref[...]

    # ------------------------------ n = ln_1(x + a) ---------------------------
    n = _layernorm(x2 + a, g1_ref[...], beta1_ref[...])

    # ------------------- m = mlp(n)  (dropout = eval / identity) --------------
    hid = jnp.dot(n.astype(mm), w_fc_ref[...],
                  preferred_element_type=jnp.float32) + b_fc_ref[...]
    hid = _gelu_tanh(hid)
    m = jnp.dot(hid.astype(mm), w_pr_ref[...],
                preferred_element_type=jnp.float32) + b_pr_ref[...]

    # ------------------------------ h = ln_2(n + m) ----------------------------
    o_ref[...] = _layernorm(n + m, g2_ref[...], beta2_ref[...]).astype(o_ref.dtype)


def _pick_batch_block(B, T):
    # Target ~256 token rows per grid step (fills the 256-wide MXU on
    # v6e/v7x), but keep >=2 grid steps when B allows so activation DMA
    # overlaps compute and both v7x TensorCores get work.  Tiles must hold
    # whole sequences (causal attention), so the tiling unit is a batch
    # element.
    bb = max(1, min(max(1, 256 // T), max(1, B // 2)))
    while B % bb:
        bb -= 1
    return bb


def transformer_block(x, params, num_heads, *, batch_block=None,
                      matmul_dtype=jnp.bfloat16, approx_recip=True):
    """matmul_dtype: MXU operand dtype for the four big GEMMs (f32
    accumulation is always kept via preferred_element_type); bf16 is native
    on v5e/v6e/v7x.  approx_recip: use the EUP approximate reciprocal in the
    softmax normalization (set False for bit-closer-to-torch numerics)."""
    B, T, C = x.shape
    if batch_block is None:
        batch_block = _pick_batch_block(B, T)
    assert B % batch_block == 0
    tile_m = batch_block * T
    grid = (B // batch_block,)

    wcast = lambda w: w.astype(matmul_dtype)
    r2 = lambda v: v.reshape(1, -1).astype(jnp.float32)   # 1-D params -> (1, N)

    x2d = x.reshape(B * T, C)     # token-row slab (reshape in wrapper, not kernel)

    args = (
        x2d,
        wcast(params["w_qkv"]), r2(params["b_qkv"]),
        wcast(params["w_o"]),   r2(params["b_o"]),
        r2(params["g1"]), r2(params["beta1"]),
        wcast(params["w_fc"]),  r2(params["b_fc"]),
        wcast(params["w_pr"]),  r2(params["b_pr"]),
        r2(params["g2"]), r2(params["beta2"]),
    )

    # Activations tile over token rows; weights/biases use a constant
    # index_map so they are DMA'd once and stay VMEM-resident across steps.
    in_specs = [pl.BlockSpec((tile_m, C), lambda g: (g, 0))]
    for arr in args[1:]:
        in_specs.append(pl.BlockSpec(arr.shape, lambda g: (0, 0)))

    out2d = pl.pallas_call(
        partial(transformer_block_kernel, num_heads=num_heads, seq_len=T,
                approx_recip=approx_recip),
        out_shape=jax.ShapeDtypeStruct((B * T, C), x.dtype),
        grid=grid,
        in_specs=in_specs,
        out_specs=pl.BlockSpec((tile_m, C), lambda g: (g, 0)),
        compiler_params=pltpu.CompilerParams(
            dimension_semantics=("parallel",)),
    )(*args)
    return out2d.reshape(B, T, C)


def reference(x, p, num_heads):
    """Pure-JAX reference mirroring the PyTorch forward (exact division)."""
    def ln(v, g, b):
        mu = v.mean(-1, keepdims=True)
        var = ((v - mu) ** 2).mean(-1, keepdims=True)
        return (v - mu) / jnp.sqrt(var + EPS) * g + b

    B, T, C = x.shape
    hd = C // num_heads
    qkv = x @ p["w_qkv"] + p["b_qkv"]
    q, k, v = jnp.split(qkv, 3, axis=-1)
    q = q.reshape(B, T, num_heads, hd).transpose(0, 2, 1, 3)
    k = k.reshape(B, T, num_heads, hd).transpose(0, 2, 1, 3)
    v = v.reshape(B, T, num_heads, hd).transpose(0, 2, 1, 3)
    s = (q @ jnp.swapaxes(k, -1, -2)) / math.sqrt(hd)
    mask = jnp.tril(jnp.ones((T, T), dtype=bool))
    s = jnp.where(mask, s, -jnp.inf)
    att = jax.nn.softmax(s, axis=-1)
    y = (att @ v).transpose(0, 2, 1, 3).reshape(B, T, C)
    a = y @ p["w_o"] + p["b_o"]
    n = ln(x + a, p["g1"], p["beta1"])
    m = _gelu_tanh(n @ p["w_fc"] + p["b_fc"]) @ p["w_pr"] + p["b_pr"]
    return ln(n + m, p["g2"], p["beta2"])


if __name__ == "__main__":
    B, T, C, NH = 2, 8, 32, 4   # batch, seq, embedding_dim, num_heads

    key = jax.random.PRNGKey(0)
    ks = jax.random.split(key, 7)

    params = {
        # attention (weights stored pre-transposed as (in, out): y = x @ W + b)
        "w_qkv": 0.02 * jax.random.normal(ks[0], (C, 3 * C), jnp.float32),
        "b_qkv": 0.02 * jax.random.normal(ks[1], (3 * C,), jnp.float32),
        "w_o":   0.02 * jax.random.normal(ks[2], (C, C), jnp.float32),
        "b_o":   0.02 * jax.random.normal(ks[3], (C,), jnp.float32),
        # ln_1 (fresh torch.nn.LayerNorm init)
        "g1": jnp.ones((C,), jnp.float32),
        "beta1": jnp.zeros((C,), jnp.float32),
        # mlp
        "w_fc": 0.02 * jax.random.normal(ks[4], (C, 4 * C), jnp.float32),
        "b_fc": jnp.zeros((4 * C,), jnp.float32),
        "w_pr": 0.02 * jax.random.normal(ks[5], (4 * C, C), jnp.float32),
        "b_pr": jnp.zeros((C,), jnp.float32),
        # ln_2
        "g2": jnp.ones((C,), jnp.float32),
        "beta2": jnp.zeros((C,), jnp.float32),
    }

    x = jax.random.normal(ks[6], (B, T, C), jnp.float32)

    # Default deployment path: bf16 MXU operands + approx softmax reciprocal.
    out = jax.block_until_ready(transformer_block(x, params, NH))

    # Verification path: f32 GEMM operands + exact division (tight numerics).
    out_f32 = jax.block_until_ready(
        transformer_block(x, params, NH, matmul_dtype=jnp.float32,
                          approx_recip=False))

    ref = reference(x, params, NH)
    assert out.shape == (B, T, C)
    assert out.dtype == x.dtype

    err_f32 = jnp.max(jnp.abs(out_f32 - ref))
    assert jnp.allclose(out_f32, ref, atol=2e-3, rtol=2e-3), \
        f"f32 path max abs err {err_f32}"
    err_bf16 = jnp.max(jnp.abs(out - ref))
    assert jnp.allclose(out, ref, atol=2e-2, rtol=2e-2), \
        f"bf16 path max abs err {err_bf16}"

    print("KERNEL_OK")
</pallas_src>

<mosaic_0001>
module attributes {stable_mosaic.version = 11 : i64} {
  func.func @transformer_block_kernel(%arg0: i32, %arg1: memref<8x32xf32, #tpu.memory_space<vmem>>, %arg2: memref<32x96xbf16, #tpu.memory_space<vmem>>, %arg3: memref<1x96xf32, #tpu.memory_space<vmem>>, %arg4: memref<32x32xbf16, #tpu.memory_space<vmem>>, %arg5: memref<1x32xf32, #tpu.memory_space<vmem>>, %arg6: memref<1x32xf32, #tpu.memory_space<vmem>>, %arg7: memref<1x32xf32, #tpu.memory_space<vmem>>, %arg8: memref<32x128xbf16, #tpu.memory_space<vmem>>, %arg9: memref<1x128xf32, #tpu.memory_space<vmem>>, %arg10: memref<128x32xbf16, #tpu.memory_space<vmem>>, %arg11: memref<1x32xf32, #tpu.memory_space<vmem>>, %arg12: memref<1x32xf32, #tpu.memory_space<vmem>>, %arg13: memref<1x32xf32, #tpu.memory_space<vmem>>, %arg14: memref<8x32xf32, #tpu.memory_space<vmem>>) attributes {dimension_semantics = [#tpu.dimension_semantics<parallel>], iteration_bounds = array<i64: 2>, scalar_prefetch = 0 : i64, scratch_operands = 0 : i64, tpu.core_type = #tpu.core_type<tc>, window_params = [{transform_indices = @transform_0, window_bounds = array<i64: 8, 32>}, {pipeline_mode = #tpu.pipeline_mode<synchronous>, transform_indices = @transform_1, window_bounds = array<i64: 32, 96>}, {pipeline_mode = #tpu.pipeline_mode<synchronous>, transform_indices = @transform_2, window_bounds = array<i64: 1, 96>}, {pipeline_mode = #tpu.pipeline_mode<synchronous>, transform_indices = @transform_3, window_bounds = array<i64: 32, 32>}, {pipeline_mode = #tpu.pipeline_mode<synchronous>, transform_indices = @transform_4, window_bounds = array<i64: 1, 32>}, {pipeline_mode = #tpu.pipeline_mode<synchronous>, transform_indices = @transform_5, window_bounds = array<i64: 1, 32>}, {pipeline_mode = #tpu.pipeline_mode<synchronous>, transform_indices = @transform_6, window_bounds = array<i64: 1, 32>}, {pipeline_mode = #tpu.pipeline_mode<synchronous>, transform_indices = @transform_7, window_bounds = array<i64: 32, 128>}, {pipeline_mode = #tpu.pipeline_mode<synchronous>, transform_indices = @transform_8, window_bounds = array<i64: 1, 128>}, {pipeline_mode = #tpu.pipeline_mode<synchronous>, transform_indices = @transform_9, window_bounds = array<i64: 128, 32>}, {pipeline_mode = #tpu.pipeline_mode<synchronous>, transform_indices = @transform_10, window_bounds = array<i64: 1, 32>}, {pipeline_mode = #tpu.pipeline_mode<synchronous>, transform_indices = @transform_11, window_bounds = array<i64: 1, 32>}, {pipeline_mode = #tpu.pipeline_mode<synchronous>, transform_indices = @transform_12, window_bounds = array<i64: 1, 32>}, {transform_indices = @transform_13, window_bounds = array<i64: 8, 32>}]} {
    %c0 = arith.constant 0 : index
    %c0_0 = arith.constant 0 : index
    %0 = vector.load %arg1[%c0, %c0_0] : memref<8x32xf32, #tpu.memory_space<vmem>>, vector<8x32xf32>
    %1 = arith.truncf %0 : vector<8x32xf32> to vector<8x32xbf16>
    %c0_1 = arith.constant 0 : index
    %c0_2 = arith.constant 0 : index
    %2 = vector.load %arg2[%c0_1, %c0_2] : memref<32x96xbf16, #tpu.memory_space<vmem>>, vector<32x96xbf16>
    %cst = arith.constant dense<0.000000e+00> : vector<8x96xf32>
    %3 = tpu.matmul %1, %2, %cst {dimension_numbers = #tpu.dot_dimension_numbers<[1], [0], [0], [1], [0, 0, 1, 1], [], []>} : vector<8x32xbf16>, vector<32x96xbf16>, vector<8x96xf32> -> vector<8x96xf32>
    %c0_3 = arith.constant 0 : index
    %c0_4 = arith.constant 0 : index
    %4 = vector.load %arg3[%c0_3, %c0_4] : memref<1x96xf32, #tpu.memory_space<vmem>>, vector<1x96xf32>
    %5 = vector.broadcast %4 : vector<1x96xf32> to vector<8x96xf32>
    %6 = arith.addf %3, %5 : vector<8x96xf32>
    %7 = vector.extract_strided_slice %6 {offsets = [0, 0], sizes = [8, 32], strides = [1, 1]} : vector<8x96xf32> to vector<8x32xf32>
    %8 = vector.extract_strided_slice %6 {offsets = [0, 32], sizes = [8, 32], strides = [1, 1]} : vector<8x96xf32> to vector<8x32xf32>
    %9 = vector.extract_strided_slice %6 {offsets = [0, 64], sizes = [8, 32], strides = [1, 1]} : vector<8x96xf32> to vector<8x32xf32>
    %c0_5 = arith.constant 0 : index
    %c0_6 = arith.constant 0 : index
    %10 = vector.load %arg4[%c0_5, %c0_6] : memref<32x32xbf16, #tpu.memory_space<vmem>>, vector<32x32xbf16>
    %11 = tpu.iota {dimensions = array<i32: 0>} : vector<8x8xi32>
    %12 = tpu.iota {dimensions = array<i32: 1>} : vector<8x8xi32>
    %13 = arith.cmpi sle, %12, %11 : vector<8x8xi32>
    %14 = vector.shape_cast %13 : vector<8x8xi1> to vector<1x8x8xi1>
    %cst_7 = arith.constant 0.000000e+00 : f32
    %15 = vector.broadcast %cst_7 : f32 to vector<8x32xf32>
    %16 = vector.extract_strided_slice %7 {offsets = [0, 0], sizes = [8, 8], strides = [1, 1]} : vector<8x32xf32> to vector<8x8xf32>
    %17 = vector.shape_cast %16 : vector<8x8xf32> to vector<1x8x8xf32>
    %18 = vector.extract_strided_slice %8 {offsets = [0, 0], sizes = [8, 8], strides = [1, 1]} : vector<8x32xf32> to vector<8x8xf32>
    %19 = vector.shape_cast %18 : vector<8x8xf32> to vector<1x8x8xf32>
    %20 = vector.extract_strided_slice %9 {offsets = [0, 0], sizes = [8, 8], strides = [1, 1]} : vector<8x32xf32> to vector<8x8xf32>
    %21 = vector.shape_cast %20 : vector<8x8xf32> to vector<1x8x8xf32>
    "tpu.trace_start"() <{level = 10 : i32, message = "btd,bsd->bts"}> : () -> ()
    %cst_8 = arith.constant dense<0.000000e+00> : vector<1x8x8xf32>
    %22 = tpu.matmul %17, %19, %cst_8 {dimension_numbers = #tpu.dot_dimension_numbers<[2], [2], [1], [1], [0, 0, 0, 1, 1, 1], [0], [0]>} : vector<1x8x8xf32>, vector<1x8x8xf32>, vector<1x8x8xf32> -> vector<1x8x8xf32>
    "tpu.trace_stop"() : () -> ()
    %cst_9 = arith.constant 0.353553385 : f32
    %23 = vector.broadcast %cst_9 : f32 to vector<1x8x8xf32>
    %24 = arith.mulf %22, %23 : vector<1x8x8xf32>
    %cst_10 = arith.constant -1.000000e+30 : f32
    %25 = vector.broadcast %cst_10 : f32 to vector<1x8x8xf32>
    %26 = arith.select %14, %24, %25 : vector<1x8x8xi1>, vector<1x8x8xf32>
    %cst_11 = arith.constant dense<0xFF800000> : vector<1x8xf32>
    %27 = vector.multi_reduction <maximumf>, %26, %cst_11 [2] : vector<1x8x8xf32> to vector<1x8xf32>
    %28 = vector.shape_cast %27 : vector<1x8xf32> to vector<1x8x1xf32>
    %29 = vector.broadcast %28 : vector<1x8x1xf32> to vector<1x8x8xf32>
    %30 = arith.subf %26, %29 : vector<1x8x8xf32>
    %31 = math.exp %30 : vector<1x8x8xf32>
    %cst_12 = arith.constant dense<0.000000e+00> : vector<1x8xf32>
    %32 = vector.multi_reduction <add>, %31, %cst_12 [2] : vector<1x8x8xf32> to vector<1x8xf32>
    %33 = vector.shape_cast %32 : vector<1x8xf32> to vector<1x8x1xf32>
    "tpu.trace_start"() <{level = 10 : i32, message = "bts,bsd->btd"}> : () -> ()
    %cst_13 = arith.constant dense<0.000000e+00> : vector<1x8x8xf32>
    %34 = tpu.matmul %31, %21, %cst_13 {dimension_numbers = #tpu.dot_dimension_numbers<[2], [1], [1], [2], [0, 0, 0, 1, 1, 2], [0], [0]>} : vector<1x8x8xf32>, vector<1x8x8xf32>, vector<1x8x8xf32> -> vector<1x8x8xf32>
    "tpu.trace_stop"() : () -> ()
    %35 = tpu.reciprocal %33 {approx = true} : vector<1x8x1xf32> -> vector<1x8x1xf32>
    %36 = vector.broadcast %35 : vector<1x8x1xf32> to vector<1x8x8xf32>
    %37 = arith.mulf %34, %36 : vector<1x8x8xf32>
    %38 = vector.shape_cast %37 : vector<1x8x8xf32> to vector<8x8xf32>
    %39 = arith.truncf %38 : vector<8x8xf32> to vector<8x8xbf16>
    %40 = vector.extract_strided_slice %10 {offsets = [0, 0], sizes = [8, 32], strides = [1, 1]} : vector<32x32xbf16> to vector<8x32xbf16>
    %cst_14 = arith.constant dense<0.000000e+00> : vector<8x32xf32>
    %41 = tpu.matmul %39, %40, %cst_14 {dimension_numbers = #tpu.dot_dimension_numbers<[1], [0], [0], [1], [0, 0, 1, 1], [], []>} : vector<8x8xbf16>, vector<8x32xbf16>, vector<8x32xf32> -> vector<8x32xf32>
    %42 = arith.addf %15, %41 : vector<8x32xf32>
    %43 = vector.extract_strided_slice %7 {offsets = [0, 8], sizes = [8, 8], strides = [1, 1]} : vector<8x32xf32> to vector<8x8xf32>
    %44 = vector.shape_cast %43 : vector<8x8xf32> to vector<1x8x8xf32>
    %45 = vector.extract_strided_slice %8 {offsets = [0, 8], sizes = [8, 8], strides = [1, 1]} : vector<8x32xf32> to vector<8x8xf32>
    %46 = vector.shape_cast %45 : vector<8x8xf32> to vector<1x8x8xf32>
    %47 = vector.extract_strided_slice %9 {offsets = [0, 8], sizes = [8, 8], strides = [1, 1]} : vector<8x32xf32> to vector<8x8xf32>
    %48 = vector.shape_cast %47 : vector<8x8xf32> to vector<1x8x8xf32>
    "tpu.trace_start"() <{level = 10 : i32, message = "btd,bsd->bts"}> : () -> ()
    %cst_15 = arith.constant dense<0.000000e+00> : vector<1x8x8xf32>
    %49 = tpu.matmul %44, %46, %cst_15 {dimension_numbers = #tpu.dot_dimension_numbers<[2], [2], [1], [1], [0, 0, 0, 1, 1, 1], [0], [0]>} : vector<1x8x8xf32>, vector<1x8x8xf32>, vector<1x8x8xf32> -> vector<1x8x8xf32>
    "tpu.trace_stop"() : () -> ()
    %cst_16 = arith.constant 0.353553385 : f32
    %50 = vector.broadcast %cst_16 : f32 to vector<1x8x8xf32>
    %51 = arith.mulf %49, %50 : vector<1x8x8xf32>
    %cst_17 = arith.constant -1.000000e+30 : f32
    %52 = vector.broadcast %cst_17 : f32 to vector<1x8x8xf32>
    %53 = arith.select %14, %51, %52 : vector<1x8x8xi1>, vector<1x8x8xf32>
    %cst_18 = arith.constant dense<0xFF800000> : vector<1x8xf32>
    %54 = vector.multi_reduction <maximumf>, %53, %cst_18 [2] : vector<1x8x8xf32> to vector<1x8xf32>
    %55 = vector.shape_cast %54 : vector<1x8xf32> to vector<1x8x1xf32>
    %56 = vector.broadcast %55 : vector<1x8x1xf32> to vector<1x8x8xf32>
    %57 = arith.subf %53, %56 : vector<1x8x8xf32>
    %58 = math.exp %57 : vector<1x8x8xf32>
    %cst_19 = arith.constant dense<0.000000e+00> : vector<1x8xf32>
    %59 = vector.multi_reduction <add>, %58, %cst_19 [2] : vector<1x8x8xf32> to vector<1x8xf32>
    %60 = vector.shape_cast %59 : vector<1x8xf32> to vector<1x8x1xf32>
    "tpu.trace_start"() <{level = 10 : i32, message = "bts,bsd->btd"}> : () -> ()
    %cst_20 = arith.constant dense<0.000000e+00> : vector<1x8x8xf32>
    %61 = tpu.matmul %58, %48, %cst_20 {dimension_numbers = #tpu.dot_dimension_numbers<[2], [1], [1], [2], [0, 0, 0, 1, 1, 2], [0], [0]>} : vector<1x8x8xf32>, vector<1x8x8xf32>, vector<1x8x8xf32> -> vector<1x8x8xf32>
    "tpu.trace_stop"() : () -> ()
    %62 = tpu.reciprocal %60 {approx = true} : vector<1x8x1xf32> -> vector<1x8x1xf32>
    %63 = vector.broadcast %62 : vector<1x8x1xf32> to vector<1x8x8xf32>
    %64 = arith.mulf %61, %63 : vector<1x8x8xf32>
    %65 = vector.shape_cast %64 : vector<1x8x8xf32> to vector<8x8xf32>
    %66 = arith.truncf %65 : vector<8x8xf32> to vector<8x8xbf16>
    %67 = vector.extract_strided_slice %10 {offsets = [8, 0], sizes = [8, 32], strides = [1, 1]} : vector<32x32xbf16> to vector<8x32xbf16>
    %cst_21 = arith.constant dense<0.000000e+00> : vector<8x32xf32>
    %68 = tpu.matmul %66, %67, %cst_21 {dimension_numbers = #tpu.dot_dimension_numbers<[1], [0], [0], [1], [0, 0, 1, 1], [], []>} : vector<8x8xbf16>, vector<8x32xbf16>, vector<8x32xf32> -> vector<8x32xf32>
    %69 = arith.addf %42, %68 : vector<8x32xf32>
    %70 = vector.extract_strided_slice %7 {offsets = [0, 16], sizes = [8, 8], strides = [1, 1]} : vector<8x32xf32> to vector<8x8xf32>
    %71 = vector.shape_cast %70 : vector<8x8xf32> to vector<1x8x8xf32>
    %72 = vector.extract_strided_slice %8 {offsets = [0, 16], sizes = [8, 8], strides = [1, 1]} : vector<8x32xf32> to vector<8x8xf32>
    %73 = vector.shape_cast %72 : vector<8x8xf32> to vector<1x8x8xf32>
    %74 = vector.extract_strided_slice %9 {offsets = [0, 16], sizes = [8, 8], strides = [1, 1]} : vector<8x32xf32> to vector<8x8xf32>
    %75 = vector.shape_cast %74 : vector<8x8xf32> to vector<1x8x8xf32>
    "tpu.trace_start"() <{level = 10 : i32, message = "btd,bsd->bts"}> : () -> ()
    %cst_22 = arith.constant dense<0.000000e+00> : vector<1x8x8xf32>
    %76 = tpu.matmul %71, %73, %cst_22 {dimension_numbers = #tpu.dot_dimension_numbers<[2], [2], [1], [1], [0, 0, 0, 1, 1, 1], [0], [0]>} : vector<1x8x8xf32>, vector<1x8x8xf32>, vector<1x8x8xf32> -> vector<1x8x8xf32>
    "tpu.trace_stop"() : () -> ()
    %cst_23 = arith.constant 0.353553385 : f32
    %77 = vector.broadcast %cst_23 : f32 to vector<1x8x8xf32>
    %78 = arith.mulf %76, %77 : vector<1x8x8xf32>
    %cst_24 = arith.constant -1.000000e+30 : f32
    %79 = vector.broadcast %cst_24 : f32 to vector<1x8x8xf32>
    %80 = arith.select %14, %78, %79 : vector<1x8x8xi1>, vector<1x8x8xf32>
    %cst_25 = arith.constant dense<0xFF800000> : vector<1x8xf32>
    %81 = vector.multi_reduction <maximumf>, %80, %cst_25 [2] : vector<1x8x8xf32> to vector<1x8xf32>
    %82 = vector.shape_cast %81 : vector<1x8xf32> to vector<1x8x1xf32>
    %83 = vector.broadcast %82 : vector<1x8x1xf32> to vector<1x8x8xf32>
    %84 = arith.subf %80, %83 : vector<1x8x8xf32>
    %85 = math.exp %84 : vector<1x8x8xf32>
    %cst_26 = arith.constant dense<0.000000e+00> : vector<1x8xf32>
    %86 = vector.multi_reduction <add>, %85, %cst_26 [2] : vector<1x8x8xf32> to vector<1x8xf32>
    %87 = vector.shape_cast %86 : vector<1x8xf32> to vector<1x8x1xf32>
    "tpu.trace_start"() <{level = 10 : i32, message = "bts,bsd->btd"}> : () -> ()
    %cst_27 = arith.constant dense<0.000000e+00> : vector<1x8x8xf32>
    %88 = tpu.matmul %85, %75, %cst_27 {dimension_numbers = #tpu.dot_dimension_numbers<[2], [1], [1], [2], [0, 0, 0, 1, 1, 2], [0], [0]>} : vector<1x8x8xf32>, vector<1x8x8xf32>, vector<1x8x8xf32> -> vector<1x8x8xf32>
    "tpu.trace_stop"() : () -> ()
    %89 = tpu.reciprocal %87 {approx = true} : vector<1x8x1xf32> -> vector<1x8x1xf32>
    %90 = vector.broadcast %89 : vector<1x8x1xf32> to vector<1x8x8xf32>
    %91 = arith.mulf %88, %90 : vector<1x8x8xf32>
    %92 = vector.shape_cast %91 : vector<1x8x8xf32> to vector<8x8xf32>
    %93 = arith.truncf %92 : vector<8x8xf32> to vector<8x8xbf16>
    %94 = vector.extract_strided_slice %10 {offsets = [16, 0], sizes = [8, 32], strides = [1, 1]} : vector<32x32xbf16> to vector<8x32xbf16>
    %cst_28 = arith.constant dense<0.000000e+00> : vector<8x32xf32>
    %95 = tpu.matmul %93, %94, %cst_28 {dimension_numbers = #tpu.dot_dimension_numbers<[1], [0], [0], [1], [0, 0, 1, 1], [], []>} : vector<8x8xbf16>, vector<8x32xbf16>, vector<8x32xf32> -> vector<8x32xf32>
    %96 = arith.addf %69, %95 : vector<8x32xf32>
    %97 = vector.extract_strided_slice %7 {offsets = [0, 24], sizes = [8, 8], strides = [1, 1]} : vector<8x32xf32> to vector<8x8xf32>
    %98 = vector.shape_cast %97 : vector<8x8xf32> to vector<1x8x8xf32>
    %99 = vector.extract_strided_slice %8 {offsets = [0, 24], sizes = [8, 8], strides = [1, 1]} : vector<8x32xf32> to vector<8x8xf32>
    %100 = vector.shape_cast %99 : vector<8x8xf32> to vector<1x8x8xf32>
    %101 = vector.extract_strided_slice %9 {offsets = [0, 24], sizes = [8, 8], strides = [1, 1]} : vector<8x32xf32> to vector<8x8xf32>
    %102 = vector.shape_cast %101 : vector<8x8xf32> to vector<1x8x8xf32>
    "tpu.trace_start"() <{level = 10 : i32, message = "btd,bsd->bts"}> : () -> ()
    %cst_29 = arith.constant dense<0.000000e+00> : vector<1x8x8xf32>
    %103 = tpu.matmul %98, %100, %cst_29 {dimension_numbers = #tpu.dot_dimension_numbers<[2], [2], [1], [1], [0, 0, 0, 1, 1, 1], [0], [0]>} : vector<1x8x8xf32>, vector<1x8x8xf32>, vector<1x8x8xf32> -> vector<1x8x8xf32>
    "tpu.trace_stop"() : () -> ()
    %cst_30 = arith.constant 0.353553385 : f32
    %104 = vector.broadcast %cst_30 : f32 to vector<1x8x8xf32>
    %105 = arith.mulf %103, %104 : vector<1x8x8xf32>
    %cst_31 = arith.constant -1.000000e+30 : f32
    %106 = vector.broadcast %cst_31 : f32 to vector<1x8x8xf32>
    %107 = arith.select %14, %105, %106 : vector<1x8x8xi1>, vector<1x8x8xf32>
    %cst_32 = arith.constant dense<0xFF800000> : vector<1x8xf32>
    %108 = vector.multi_reduction <maximumf>, %107, %cst_32 [2] : vector<1x8x8xf32> to vector<1x8xf32>
    %109 = vector.shape_cast %108 : vector<1x8xf32> to vector<1x8x1xf32>
    %110 = vector.broadcast %109 : vector<1x8x1xf32> to vector<1x8x8xf32>
    %111 = arith.subf %107, %110 : vector<1x8x8xf32>
    %112 = math.exp %111 : vector<1x8x8xf32>
    %cst_33 = arith.constant dense<0.000000e+00> : vector<1x8xf32>
    %113 = vector.multi_reduction <add>, %112, %cst_33 [2] : vector<1x8x8xf32> to vector<1x8xf32>
    %114 = vector.shape_cast %113 : vector<1x8xf32> to vector<1x8x1xf32>
    "tpu.trace_start"() <{level = 10 : i32, message = "bts,bsd->btd"}> : () -> ()
    %cst_34 = arith.constant dense<0.000000e+00> : vector<1x8x8xf32>
    %115 = tpu.matmul %112, %102, %cst_34 {dimension_numbers = #tpu.dot_dimension_numbers<[2], [1], [1], [2], [0, 0, 0, 1, 1, 2], [0], [0]>} : vector<1x8x8xf32>, vector<1x8x8xf32>, vector<1x8x8xf32> -> vector<1x8x8xf32>
    "tpu.trace_stop"() : () -> ()
    %116 = tpu.reciprocal %114 {approx = true} : vector<1x8x1xf32> -> vector<1x8x1xf32>
    %117 = vector.broadcast %116 : vector<1x8x1xf32> to vector<1x8x8xf32>
    %118 = arith.mulf %115, %117 : vector<1x8x8xf32>
    %119 = vector.shape_cast %118 : vector<1x8x8xf32> to vector<8x8xf32>
    %120 = arith.truncf %119 : vector<8x8xf32> to vector<8x8xbf16>
    %121 = vector.extract_strided_slice %10 {offsets = [24, 0], sizes = [8, 32], strides = [1, 1]} : vector<32x32xbf16> to vector<8x32xbf16>
    %cst_35 = arith.constant dense<0.000000e+00> : vector<8x32xf32>
    %122 = tpu.matmul %120, %121, %cst_35 {dimension_numbers = #tpu.dot_dimension_numbers<[1], [0], [0], [1], [0, 0, 1, 1], [], []>} : vector<8x8xbf16>, vector<8x32xbf16>, vector<8x32xf32> -> vector<8x32xf32>
    %123 = arith.addf %96, %122 : vector<8x32xf32>
    %c0_36 = arith.constant 0 : index
    %c0_37 = arith.constant 0 : index
    %124 = vector.load %arg5[%c0_36, %c0_37] : memref<1x32xf32, #tpu.memory_space<vmem>>, vector<1x32xf32>
    %125 = vector.broadcast %124 : vector<1x32xf32> to vector<8x32xf32>
    %126 = arith.addf %123, %125 : vector<8x32xf32>
    %127 = arith.addf %0, %126 : vector<8x32xf32>
    %c0_38 = arith.constant 0 : index
    %c0_39 = arith.constant 0 : index
    %128 = vector.load %arg6[%c0_38, %c0_39] : memref<1x32xf32, #tpu.memory_space<vmem>>, vector<1x32xf32>
    %c0_40 = arith.constant 0 : index
    %c0_41 = arith.constant 0 : index
    %129 = vector.load %arg7[%c0_40, %c0_41] : memref<1x32xf32, #tpu.memory_space<vmem>>, vector<1x32xf32>
    %cst_42 = arith.constant dense<0.000000e+00> : vector<8xf32>
    %130 = vector.multi_reduction <add>, %127, %cst_42 [1] : vector<8x32xf32> to vector<8xf32>
    %131 = vector.shape_cast %130 : vector<8xf32> to vector<8x1xf32>
    %cst_43 = arith.constant 3.200000e+01 : f32
    %132 = vector.broadcast %cst_43 : f32 to vector<8x1xf32>
    %133 = arith.divf %131, %132 : vector<8x1xf32>
    %134 = vector.broadcast %133 : vector<8x1xf32> to vector<8x32xf32>
    %135 = arith.subf %127, %134 : vector<8x32xf32>
    %136 = arith.mulf %135, %135 : vector<8x32xf32>
    %cst_44 = arith.constant dense<0.000000e+00> : vector<8xf32>
    %137 = vector.multi_reduction <add>, %136, %cst_44 [1] : vector<8x32xf32> to vector<8xf32>
    %138 = vector.shape_cast %137 : vector<8xf32> to vector<8x1xf32>
    %cst_45 = arith.constant 3.200000e+01 : f32
    %139 = vector.broadcast %cst_45 : f32 to vector<8x1xf32>
    %140 = arith.divf %138, %139 : vector<8x1xf32>
    %141 = vector.broadcast %133 : vector<8x1xf32> to vector<8x32xf32>
    %142 = arith.subf %127, %141 : vector<8x32xf32>
    %cst_46 = arith.constant 9.99999974E-6 : f32
    %143 = vector.broadcast %cst_46 : f32 to vector<8x1xf32>
    %144 = arith.addf %140, %143 : vector<8x1xf32>
    %145 = math.rsqrt %144 : vector<8x1xf32>
    %146 = vector.broadcast %145 : vector<8x1xf32> to vector<8x32xf32>
    %147 = arith.mulf %142, %146 : vector<8x32xf32>
    %148 = vector.broadcast %128 : vector<1x32xf32> to vector<8x32xf32>
    %149 = arith.mulf %147, %148 : vector<8x32xf32>
    %150 = vector.broadcast %129 : vector<1x32xf32> to vector<8x32xf32>
    %151 = arith.addf %149, %150 : vector<8x32xf32>
    %152 = arith.truncf %151 : vector<8x32xf32> to vector<8x32xbf16>
    %c0_47 = arith.constant 0 : index
    %c0_48 = arith.constant 0 : index
    %153 = vector.load %arg8[%c0_47, %c0_48] : memref<32x128xbf16, #tpu.memory_space<vmem>>, vector<32x128xbf16>
    %cst_49 = arith.constant dense<0.000000e+00> : vector<8x128xf32>
    %154 = tpu.matmul %152, %153, %cst_49 {dimension_numbers = #tpu.dot_dimension_numbers<[1], [0], [0], [1], [0, 0, 1, 1], [], []>} : vector<8x32xbf16>, vector<32x128xbf16>, vector<8x128xf32> -> vector<8x128xf32>
    %c0_50 = arith.constant 0 : index
    %c0_51 = arith.constant 0 : index
    %155 = vector.load %arg9[%c0_50, %c0_51] : memref<1x128xf32, #tpu.memory_space<vmem>>, vector<1x128xf32>
    %156 = vector.broadcast %155 : vector<1x128xf32> to vector<8x128xf32>
    %157 = arith.addf %154, %156 : vector<8x128xf32>
    %cst_52 = arith.constant 5.000000e-01 : f32
    %158 = vector.broadcast %cst_52 : f32 to vector<8x128xf32>
    %159 = arith.mulf %158, %157 : vector<8x128xf32>
    %cst_53 = arith.constant 4.471500e-02 : f32
    %160 = vector.broadcast %cst_53 : f32 to vector<8x128xf32>
    %161 = arith.mulf %160, %157 : vector<8x128xf32>
    %162 = arith.mulf %161, %157 : vector<8x128xf32>
    %163 = arith.mulf %162, %157 : vector<8x128xf32>
    %164 = arith.addf %157, %163 : vector<8x128xf32>
    %cst_54 = arith.constant 0.797884583 : f32
    %165 = vector.broadcast %cst_54 : f32 to vector<8x128xf32>
    %166 = arith.mulf %165, %164 : vector<8x128xf32>
    %167 = math.tanh %166 : vector<8x128xf32>
    %cst_55 = arith.constant 1.000000e+00 : f32
    %168 = vector.broadcast %cst_55 : f32 to vector<8x128xf32>
    %169 = arith.addf %168, %167 : vector<8x128xf32>
    %170 = arith.mulf %159, %169 : vector<8x128xf32>
    %171 = arith.truncf %170 : vector<8x128xf32> to vector<8x128xbf16>
    %c0_56 = arith.constant 0 : index
    %c0_57 = arith.constant 0 : index
    %172 = vector.load %arg10[%c0_56, %c0_57] : memref<128x32xbf16, #tpu.memory_space<vmem>>, vector<128x32xbf16>
    %cst_58 = arith.constant dense<0.000000e+00> : vector<8x32xf32>
    %173 = tpu.matmul %171, %172, %cst_58 {dimension_numbers = #tpu.dot_dimension_numbers<[1], [0], [0], [1], [0, 0, 1, 1], [], []>} : vector<8x128xbf16>, vector<128x32xbf16>, vector<8x32xf32> -> vector<8x32xf32>
    %c0_59 = arith.constant 0 : index
    %c0_60 = arith.constant 0 : index
    %174 = vector.load %arg11[%c0_59, %c0_60] : memref<1x32xf32, #tpu.memory_space<vmem>>, vector<1x32xf32>
    %175 = vector.broadcast %174 : vector<1x32xf32> to vector<8x32xf32>
    %176 = arith.addf %173, %175 : vector<8x32xf32>
    %177 = arith.addf %151, %176 : vector<8x32xf32>
    %c0_61 = arith.constant 0 : index
    %c0_62 = arith.constant 0 : index
    %178 = vector.load %arg12[%c0_61, %c0_62] : memref<1x32xf32, #tpu.memory_space<vmem>>, vector<1x32xf32>
    %c0_63 = arith.constant 0 : index
    %c0_64 = arith.constant 0 : index
    %179 = vector.load %arg13[%c0_63, %c0_64] : memref<1x32xf32, #tpu.memory_space<vmem>>, vector<1x32xf32>
    %cst_65 = arith.constant dense<0.000000e+00> : vector<8xf32>
    %180 = vector.multi_reduction <add>, %177, %cst_65 [1] : vector<8x32xf32> to vector<8xf32>
    %181 = vector.shape_cast %180 : vector<8xf32> to vector<8x1xf32>
    %cst_66 = arith.constant 3.200000e+01 : f32
    %182 = vector.broadcast %cst_66 : f32 to vector<8x1xf32>
    %183 = arith.divf %181, %182 : vector<8x1xf32>
    %184 = vector.broadcast %183 : vector<8x1xf32> to vector<8x32xf32>
    %185 = arith.subf %177, %184 : vector<8x32xf32>
    %186 = arith.mulf %185, %185 : vector<8x32xf32>
    %cst_67 = arith.constant dense<0.000000e+00> : vector<8xf32>
    %187 = vector.multi_reduction <add>, %186, %cst_67 [1] : vector<8x32xf32> to vector<8xf32>
    %188 = vector.shape_cast %187 : vector<8xf32> to vector<8x1xf32>
    %cst_68 = arith.constant 3.200000e+01 : f32
    %189 = vector.broadcast %cst_68 : f32 to vector<8x1xf32>
    %190 = arith.divf %188, %189 : vector<8x1xf32>
    %191 = vector.broadcast %183 : vector<8x1xf32> to vector<8x32xf32>
    %192 = arith.subf %177, %191 : vector<8x32xf32>
    %cst_69 = arith.constant 9.99999974E-6 : f32
    %193 = vector.broadcast %cst_69 : f32 to vector<8x1xf32>
    %194 = arith.addf %190, %193 : vector<8x1xf32>
    %195 = math.rsqrt %194 : vector<8x1xf32>
    %196 = vector.broadcast %195 : vector<8x1xf32> to vector<8x32xf32>
    %197 = arith.mulf %192, %196 : vector<8x32xf32>
    %198 = vector.broadcast %178 : vector<1x32xf32> to vector<8x32xf32>
    %199 = arith.mulf %197, %198 : vector<8x32xf32>
    %200 = vector.broadcast %179 : vector<1x32xf32> to vector<8x32xf32>
    %201 = arith.addf %199, %200 : vector<8x32xf32>
    %c0_70 = arith.constant 0 : index
    %c0_71 = arith.constant 0 : index
    %202 = vector.load %arg14[%c0_70, %c0_71] : memref<8x32xf32, #tpu.memory_space<vmem>>, vector<8x32xf32>
    tpu.vector_store %arg14[%c0_70, %c0_71], %201 {strides = array<i32>} : memref<8x32xf32, #tpu.memory_space<vmem>>, vector<8x32xf32>,
    return
  }
  func.func @transform_0(%arg0: i32) -> (i32, i32) {
    %c0_i32 = arith.constant 0 : i32
    %c0_i32_0 = arith.constant 0 : i32
    return %arg0, %c0_i32 : i32, i32
  }
  func.func @transform_1(%arg0: i32) -> (i32, i32) {
    %c0_i32 = arith.constant 0 : i32
    %c0_i32_0 = arith.constant 0 : i32
    %c0_i32_1 = arith.constant 0 : i32
    return %c0_i32, %c0_i32_0 : i32, i32
  }
  func.func @transform_2(%arg0: i32) -> (i32, i32) {
    %c0_i32 = arith.constant 0 : i32
    %c0_i32_0 = arith.constant 0 : i32
    %c0_i32_1 = arith.constant 0 : i32
    return %c0_i32, %c0_i32_0 : i32, i32
  }
  func.func @transform_3(%arg0: i32) -> (i32, i32) {
    %c0_i32 = arith.constant 0 : i32
    %c0_i32_0 = arith.constant 0 : i32
    %c0_i32_1 = arith.constant 0 : i32
    return %c0_i32, %c0_i32_0 : i32, i32
  }
  func.func @transform_4(%arg0: i32) -> (i32, i32) {
    %c0_i32 = arith.constant 0 : i32
    %c0_i32_0 = arith.constant 0 : i32
    %c0_i32_1 = arith.constant 0 : i32
    return %c0_i32, %c0_i32_0 : i32, i32
  }
  func.func @transform_5(%arg0: i32) -> (i32, i32) {
    %c0_i32 = arith.constant 0 : i32
    %c0_i32_0 = arith.constant 0 : i32
    %c0_i32_1 = arith.constant 0 : i32
    return %c0_i32, %c0_i32_0 : i32, i32
  }
  func.func @transform_6(%arg0: i32) -> (i32, i32) {
    %c0_i32 = arith.constant 0 : i32
    %c0_i32_0 = arith.constant 0 : i32
    %c0_i32_1 = arith.constant 0 : i32
    return %c0_i32, %c0_i32_0 : i32, i32
  }
  func.func @transform_7(%arg0: i32) -> (i32, i32) {
    %c0_i32 = arith.constant 0 : i32
    %c0_i32_0 = arith.constant 0 : i32
    %c0_i32_1 = arith.constant 0 : i32
    return %c0_i32, %c0_i32_0 : i32, i32
  }
  func.func @transform_8(%arg0: i32) -> (i32, i32) {
    %c0_i32 = arith.constant 0 : i32
    %c0_i32_0 = arith.constant 0 : i32
    %c0_i32_1 = arith.constant 0 : i32
    return %c0_i32, %c0_i32_0 : i32, i32
  }
  func.func @transform_9(%arg0: i32) -> (i32, i32) {
    %c0_i32 = arith.constant 0 : i32
    %c0_i32_0 = arith.constant 0 : i32
    %c0_i32_1 = arith.constant 0 : i32
    return %c0_i32, %c0_i32_0 : i32, i32
  }
  func.func @transform_10(%arg0: i32) -> (i32, i32) {
    %c0_i32 = arith.constant 0 : i32
    %c0_i32_0 = arith.constant 0 : i32
    %c0_i32_1 = arith.constant 0 : i32
    return %c0_i32, %c0_i32_0 : i32, i32
  }
  func.func @transform_11(%arg0: i32) -> (i32, i32) {
    %c0_i32 = arith.constant 0 : i32
    %c0_i32_0 = arith.constant 0 : i32
    %c0_i32_1 = arith.constant 0 : i32
    return %c0_i32, %c0_i32_0 : i32, i32
  }
  func.func @transform_12(%arg0: i32) -> (i32, i32) {
    %c0_i32 = arith.constant 0 : i32
    %c0_i32_0 = arith.constant 0 : i32
    %c0_i32_1 = arith.constant 0 : i32
    return %c0_i32, %c0_i32_0 : i32, i32
  }
  func.func @transform_13(%arg0: i32) -> (i32, i32) {
    %c0_i32 = arith.constant 0 : i32
    %c0_i32_0 = arith.constant 0 : i32
    return %arg0, %c0_i32 : i32, i32
  }
}

</mosaic_0001>

<bundles_post_ra>
// kernel: tpu_custom_call.1
= control target key start
LH: loop header
LB: loop body
LE: loop exit
PB: predicated region body
PF: predicated region fallthrough
CT: control target
= control target key end

     0   :  { %s2409_s0 = inlined_call_operand.vmem [shape: f32[16,32], index: 0, kind: input, shape index: {}]   ;;  %s2410_s1 = inlined_call_operand.vmem [shape: bf16[32,96], index: 1, kind: input, shape index: {}]   ;;  %s2411_s2 = inlined_call_operand.vmem [shape: f32[1,96], index: 2, kind: input, shape index: {}]   ;;  %s2412_s3 = inlined_call_operand.vmem [shape: bf16[32,32], index: 3, kind: input, shape index: {}]   ;;  %s2413_s4 = inlined_call_operand.vmem [shape: f32[1,32], index: 4, kind: input, shape index: {}]   ;;  %s2414_s5 = inlined_call_operand.vmem [shape: f32[1,32], index: 5, kind: input, shape index: {}]   ;;  %s2415_s6 = inlined_call_operand.vmem [shape: f32[1,32], index: 6, kind: input, shape index: {}]   ;;  %s2416_s7 = inlined_call_operand.vmem [shape: bf16[32,128], index: 7, kind: input, shape index: {}]   ;;  %s2417_s8 = inlined_call_operand.vmem [shape: f32[1,128], index: 8, kind: input, shape index: {}]   ;;  %s2418_s9 = inlined_call_operand.vmem [shape: bf16[128,32], index: 9, kind: input, shape index: {}]   ;;  %s2419_s10 = inlined_call_operand.vmem [shape: f32[1,32], index: 10, kind: input, shape index: {}]   ;;  %s2420_s11 = inlined_call_operand.vmem [shape: f32[1,32], index: 11, kind: input, shape index: {}]   ;;  %s2421_s12 = inlined_call_operand.vmem [shape: f32[1,32], index: 12, kind: input, shape index: {}]   ;;  %s2422_s13 = inlined_call_operand.hbm [shape: f32[16,32], index: 13, kind: output, shape index: {}]  }
   0x1   :  { %2423 = sst [smem:[#allocation5_spill]] %s2409_s0 }
   0x2   :  { %2424 = sst [smem:[#allocation6_spill]] %s2410_s1 }
   0x3   :  { %2425 = sst [smem:[#allocation7_spill]] %s2411_s2 }
   0x4   :  { %2426 = sst [smem:[#allocation8_spill]] %s2412_s3 }
   0x5   :  { %2427 = sst [smem:[#allocation9_spill]] %s2413_s4 }
   0x6   :  { %18 = vsyncpa [#allocation3], 0 }
   0x7   :  { %20 = vsyncpa [#allocation3 + $0x1], 0  ;;  %s2124_s25 = smov 0   ;;  %s2126_s26 = smov 0  }
   0x8   :  { %s2128_s27 = smov 0   ;;  %s2130_s28 = smov 0  }
   0x9 LB: > { %s2145_s29 = sadd.s32 4294967295, %s2038_s28   ;;  %s1705_s30 = sadd.s32 4294967294, %s2038_s28   ;;  %s2038_s28 = sphi %s2130_s28, %s2438_s28   ;;  %s2034_s27 = sphi %s2128_s27, %s2437_s27   ;;  %s2030_s26 = sphi %s2126_s26, %s2436_s26   ;;  %s2026_s25 = sphi %s2124_s25, %s2435_s25  }
   0xa   : > { %s2149_s14 = sadd.s32 1, %s2038_s28   ;;  %s311_s15 = sadd.s32 1, %s2034_s27 }
   0xb   : > { %s308_s16 = ssub.s32 %s2038_s28, %s2149_s14  ;;  %p321_p0 = scmp.ne.s32.totalorder %s2034_s27, %s2030_s26 }
   0xc   : > { %p309_p1 = scmp.eq.s32.totalorder %s308_s16, 0  ;;  %p322_p2 = scmp.eq.s32.totalorder %s2145_s29, 1 }
   0xd   : > { %p327_p3 = scmp.ne.s32.totalorder %s2030_s26, %s2026_s25  ;;  %p328_p4 = scmp.eq.s32.totalorder %s1705_s30, 1 }
   0xe   : > { %s2160_s17 = scalar_select %p309_p1, %s2034_s27, %s311_s15  }
   0xf   : > { %p2162_p5 = por %p322_p2, %p321_p0  ;;  %p2166_p6 = por %p328_p4, %p327_p3 }
  0x10   : > { %p1708_p7 = scmp.ge.s32.totalorder %s2038_s28, 1  ;;  %p389_p8 = scmp.lt.s32.totalorder %s2038_s28, 3 }
  0x12   : > { %p390_p9 = pnand %p1708_p7, %p389_p8 }
  0x13   : > { %s2430_s1 = sld [smem:[#allocation6_spill]] (!%p390_p9)  ;;  %p432_p10 = scmp.lt.s32.totalorder (!%p390_p9), %s2145_s29, 1 }
  0x14   : > { %393 = sbr.rel (%p390_p9) target bundleno = 3076 (0xc04), region = 72  ;;  %s2431_s0 = sld [smem:[#allocation5_spill]] (!%p390_p9) }
  0x15   : > { %s2432_s2 = sld [smem:[#allocation7_spill]] (!%p390_p9)  ;;  %s2042_s23 = smov (!%p390_p9), 64  }
  0x16   : > { %s2045_s15 = smov (!%p390_p9), 120   ;;  %s2046_s16 = smov (!%p390_p9), 80  }
  0x17   : > { %s2048_s21 = smov (!%p390_p9), 56   ;;  %s2049_s22 = smov (!%p390_p9), 48  }
  0x18   : > { %s2433_s3 = sld [smem:[#allocation8_spill]] (!%p390_p9) }
  0x19   : > { %v1944_v0 = vld [vmem:[%s2430_s1 + $0x8] sm:$0xff]   ;;  %v2040_v1 = vmov 0.0   ;;  %v1945_v2 = vld [vmem:[%s2430_s1] sm:$0xff]   ;;  %vm2041_vm0 = vmmov 0   ;;  %s433_s24 = scalar_select %p432_p10, %s2145_s29, 1  ;;  %vm462_vm1 = vcmask 261120   ;;  %v510_v13 = vlaneseq }
  0x1a   : > { %1792 = vmatprep.subr.bf16.mxu0 %v2040_v1  ;;  %1805 = vmatprep.subr.mxu1 %v2040_v1  ;;  %vm518_vm2 = vcmask 64512   ;;  %vm854_vm4 = vcmask 1043456   ;;  %s2434_s4 = sld [smem:[#allocation9_spill]] }
  0x1b   : > { %1793 = vmatpush3.bf16.msra.mxu0 %v1944_v0  ;;  %1796 = vmatprep.mubr.msk.bf16.mxu0 %vm2041_vm0, %v2040_v1  ;;  %s1710_s30 = sshll.u32 %s433_s24, 3  ;;  %v1711_v5 = vld [vmem:[%s2432_s2] ss:$0 sm:$0xff]  ;;  %s2043_s24 = smov 96   ;;  %v2216_v14 = vshrl.u32 %v510_v13, 7  ;;  %v2218_v15 = vand.u32 127, %v510_v13 }
  0x1c   : > { %1794 = vmatprep.subr.bf16.mxu0 %v2040_v1  ;;  %1807 = vmatprep.mubr.msk.f32.mxu1 %vm2041_vm0, %v2040_v1  ;;  %s435_s20 = scalar_lea.vmem %s2431_s0, %s1710_s30  ;;  %s2044_s30 = smov 88  }
  0x1d   : > { %v2191_v3 = vld [vmem:[%s435_s20] sm:$0xff]  ;;  %s2047_s20 = smov 112   ;;  %vm514_vm3 = vcmp.le.s32.totalorder %v2218_v15, %v2216_v14 }
  0x1e   : > { %v438_v4 = vpack.c.bf16 %v2191_v3, %v2191_v3  ;;  %v507_v48 = vld [vmem:[%s2433_s3 + $0x4] sm:$0xf]  ;;  %v506_v56 = vld [vmem:[%s2433_s3] sm:$0xf] }
  0x1f   : > { %1795 = vmatpush3.bf16.msra.mxu0 %v1945_v2  ;;  %v856_v49 = vsel %vm854_vm4, %v507_v48, 0  ;;  %v902_v61 = vsel %vm854_vm4, %v506_v56, 0 }
  0x20   : > { %1800 = vmatprep.subr.mxu0 %v2040_v1 }
  0x22   : > { %1797 = vmatmul.mubr.msk.bf16.vlgmr.msra.gmra.mxu0 %vm462_vm1, %v438_v4 }
  0x23   : > { %1802 = vmatprep.mubr.msk.f32.mxu0 %vm2041_vm0, %v2040_v1 }
  0xe2   : > { %v500_v6 = vpop.f32.mrf.mxu0 }
  0xe3   : > { %v2201_v7 = vadd.f32 %v1711_v5, %v500_v6 }
  0xe4   : > { %v1798_v8 = vpop.f32.mrf.mxu0 }
  0xe5   : > { %604 = vrot.lane.b32.xlu1 %v2201_v7, %s2042_s23  ;;  %516 = vrot.lane.b32.xlu0 %v2201_v7, %s2043_s24  ;;  %s2050_s23 = smov 72   ;;  %s2051_s24 = smov 104  }
  0xe6   : > { %v503_v9 = vpop.f32.mrf.mxu0 }
  0xe8   : > { %v1799_v10 = vpop.f32.mrf.mxu0 }
  0xe9   : > { %685 = vrot.lane.b32.xlu1 %v2201_v7, %s2044_s30  ;;  %s2052_s30 = smov 40  }
  0xed   : > { %683 = vrot.lane.b32.xlu1 %v2201_v7, %s2045_s15 }
  0xf1   : > { %946 = vrot.lane.b32.xlu1 %v2201_v7, %s2046_s16  ;;  %s2053_s16 = smov [#allocation2]  }
  0xf5   : > { %944 = vrot.lane.b32.xlu1 %v2201_v7, %s2047_s20  ;;  %s1982_s20 = sshll.u32 %s2053_s16, 4  ;;  %s1983_s20 = int_to_ptr.vmem [resolvable:$false] %s1982_s20 }
 0x157   : > { %v605_v11 = vpop.permute.xlu1 %604  ;;  %v517_v12 = vpop.permute.xlu0 %516 }
 0x158   : > { %1801 = vmatpush3.xpose.msk.msra.mxu0 %vm518_vm2, %v517_v12  ;;  %1806 = vmatpush3.msra.mxu1 %v605_v11 }
 0x159   : > { %1815 = vmatprep.subr.mxu0 %v2040_v1  ;;  %1810 = vmatprep.subr.mxu1 %v2040_v1 }
 0x15b   : > { %1803 = vmatmul.mubr.msk.f32.vlgmr.msra.gmra.mxu0 %vm518_vm2, %v2201_v7  ;;  %v686_v25 = vpop.permute.xlu1 %685 }
 0x15c   : > { %1817 = vmatprep.mubr.msk.f32.mxu0 %vm2041_vm0, %v2040_v1 }
 0x15f   : > { %v684_v26 = vpop.permute.xlu1 %683 }
 0x163   : > { %v947_v29 = vpop.permute.xlu1 %946 }
 0x167   : > { %v945_v30 = vpop.permute.xlu1 %944 }
 0x21b   : > { %v589_v16 = vpop.f32.mrf.mxu0 }
 0x21c   : > { %v593_v17 = vmul.f32 0.35355338, %v589_v16 }
 0x21d   : > { %v1804_v18 = vpop.f32.mrf.mxu0 }
 0x21e   : > { %v594_v19 = vsel %vm514_vm3, %v593_v17, -1e+30 }
 0x21f   : > { %v595_v20 = vsel %vm518_vm2, %v594_v19, -inf }
 0x220   : > { %596 = vmax.xlane.f32.xlu0 %v595_v20 }
 0x236   : > { %772 = vrot.lane.b32.xlu0 %v2201_v7, %s2048_s21 }
 0x2a9   : > { %v597_v21 = vpop.xlane.xlu0 %596 }
 0x2aa   : > { %v598_v22 = vsub.f32 %v594_v19, %v597_v21 }
 0x2ac   : > { %v599_v23 = vmul.f32 1.442695, %v598_v22 }
 0x2ad   : > { %v773_v24 = vpop.permute.xlu0 %772 }
 0x2ae   : > { %1956 = vpow2.f32 %v599_v23  ;;  %1816 = vmatpush3.msra.mxu0 %v773_v24 }
 0x2af   : > { %1820 = vmatprep.subr.bf16.mxu0 %v2040_v1 }
 0x2bb   : > { %v1957_v27 = vpop.eup %1956 }
 0x2bc   : > { %1808 = vmatmul.mubr.msk.f32.vlgmr.msra.gmra.mxu1 %vm518_vm2, %v1957_v27  ;;  %v601_v28 = vsel %vm518_vm2, %v1957_v27, 0.0  ;;  %v508_v27 = vld [vmem:[%s2433_s3 + $0x8] sm:$0xf] }
 0x2bd   : > { %1811 = vmatpush3.xpose.msk.msra.mxu1 %vm518_vm2, %v686_v25  ;;  %602 = vadd.xlane.f32.xlu0 %v601_v28  ;;  %v1116_v28 = vsel %vm854_vm4, %v508_v27, 0 }
 0x2be   : > { %1812 = vmatprep.mubr.msk.f32.mxu1 %vm2041_vm0, %v2040_v1  ;;  %1832 = vmatprep.subr.mxu1 %v2040_v1 }
 0x2c0   : > { %1813 = vmatmul.mubr.msk.f32.vlgmr.msra.gmra.mxu1 %vm518_vm2, %v684_v26 }
 0x2c1   : > { %1833 = vmatpush3.xpose.msk.msra.mxu1 %vm518_vm2, %v947_v29  ;;  %1834 = vmatprep.mubr.msk.f32.mxu1 %vm2041_vm0, %v2040_v1 }
 0x2c2   : > { %1842 = vmatprep.subr.bf16.mxu1 %v2040_v1 }
 0x2c4   : > { %1835 = vmatmul.mubr.msk.f32.vlgmr.msra.gmra.mxu1 %vm518_vm2, %v945_v30 }
 0x2c5   : > { %1844 = vmatprep.mubr.msk.bf16.mxu1 %vm2041_vm0, %v2040_v1  ;;  %1843 = vmatpush3.bf16.msra.mxu1 %v1116_v28 }
 0x2c6   : > { %1858 = vmatprep.subr.bf16.mxu1 %v2040_v1 }
 0x346   : > { %v603_v51 = vpop.xlane.xlu0 %602 }
 0x37c   : > { %v676_v31 = vpop.f32.mrf.mxu1 }
 0x37e   : > { %v1809_v32 = vpop.f32.mrf.mxu1 }
 0x380   : > { %v757_v33 = vpop.f32.mrf.mxu1 }
 0x381   : > { %v761_v34 = vmul.f32 0.35355338, %v757_v33 }
 0x382   : > { %v1814_v35 = vpop.f32.mrf.mxu1 }
 0x383   : > { %v762_v36 = vsel %vm514_vm3, %v761_v34, -1e+30 }
 0x384   : > { %v1018_v37 = vpop.f32.mrf.mxu1  ;;  %v763_v38 = vsel %vm518_vm2, %v762_v36, -inf }
 0x385   : > { %764 = vmax.xlane.f32.xlu1 %v763_v38  ;;  %v1022_v43 = vmul.f32 0.35355338, %v1018_v37 }
 0x386   : > { %v1836_v39 = vpop.f32.mrf.mxu1 }
 0x387   : > { %v1023_v46 = vsel %vm514_vm3, %v1022_v43, -1e+30 }
 0x388   : > { %v1024_v47 = vsel %vm518_vm2, %v1023_v46, -inf }
 0x40e   : > { %v765_v40 = vpop.xlane.xlu1 %764 }
 0x40f   : > { %v766_v41 = vsub.f32 %v762_v36, %v765_v40  ;;  %v509_v36 = vld [vmem:[%s2433_s3 + $0xc] sm:$0xf] }
 0x410   : > { %v1331_v37 = vsel %vm854_vm4, %v509_v36, 0 }
 0x411   : > { %v767_v42 = vmul.f32 1.442695, %v766_v41 }
 0x413   : > { %1958 = vpow2.f32 %v767_v42 }
 0x420   : > { %v1959_v44 = vpop.eup %1958 }
 0x421   : > { %1818 = vmatmul.mubr.msk.f32.vlgmr.msra.gmra.mxu0 %vm518_vm2, %v1959_v44  ;;  %v769_v45 = vsel %vm518_vm2, %v1959_v44, 0.0 }
 0x422   : > { %770 = vadd.xlane.f32.xlu1 %v769_v45  ;;  %1822 = vmatprep.mubr.msk.bf16.mxu0 %vm2041_vm0, %v2040_v1 }
 0x423   : > { %1821 = vmatpush3.bf16.msra.mxu0 %v856_v49 }
 0x424   : > { %1826 = vmatprep.subr.bf16.mxu0 %v2040_v1 }
 0x426   : > { %1025 = vmax.xlane.f32.xlu1 %v1024_v47 }
 0x437   : > { %1033 = vrot.lane.b32.xlu1 %v2201_v7, %s2049_s22  ;;  %s1750_s22 = sshll.u32 %s2145_s29, 7  ;;  %s1984_s29 = scalar_lea.vmem %s1983_s20, 256 }
 0x438   : > { %s1644_s3 = scalar_lea.hbm %s2422_s13, %s1750_s22 }
 0x43b   : > { %1161 = vrot.lane.b32.xlu1 %v2201_v7, %s2050_s23 }
 0x43f   : > { %1159 = vrot.lane.b32.xlu1 %v2201_v7, %s2051_s24  ;;  %s429_s24 = sand.u32 1, %s2030_s26  }
 0x443   : > { %1248 = vrot.lane.b32.xlu1 %v2201_v7, %s2052_s30  ;;  %s1709_s30 = sshll.u32 %s429_s24, 3 }
 0x444   : > { %s431_s23 = scalar_lea.vmem [#allocation2], %s1709_s30 }
 0x445   : > { %s1646_s0 = sshll.u32 %s431_s23, 4  ;;  %s1647_s0 = int_to_ptr.vmem [resolvable:$true] %s1646_s0 }
 0x446   : > { %s1978_s15 = scalar_lea.vmem %s1647_s0, 128  ;;  %p1985_p0 = scmp.lt.s32.totalorder %s1647_s0, %s1983_s20 }
 0x447   : > { %p1979_p11 = scmp.ne.s32.totalorder %s1647_s0, %s1978_s15  ;;  %p1986_p1 = scmp.lt.s32.totalorder %s1984_s29, %s1978_s15 }
 0x449   : > { %p1980_p12 = pnand %p1979_p11, %p2162_p5  ;;  %p1987_p2 = por %p1986_p1, %p1985_p0 }
 0x44b   : > { %p1981_p13 = pneg %p1980_p12 }
 0x44d   : > { %p1988_p3 = pnand %p1987_p2, %p1981_p13 }
 0x4ab   : > { %v771_v50 = vpop.xlane.xlu1 %770 }
 0x4ac   : > { %1960 = vrcp.f32 %v771_v50  ;;  %v1731_v50 = vld [vmem:[%s2434_s4] ss:$0 sm:$0xff]  ;;  %s1633_s4 = scalar_lea.sflag [#allocation3], %s429_s24 }
 0x4ad   : > { %1962 = vrcp.f32 %v603_v51 }
 0x4af   : > { %v1026_v52 = vpop.xlane.xlu1 %1025 }
 0x4b0   : > { %v1027_v53 = vsub.f32 %v1023_v46, %v1026_v52 }
 0x4b2   : > { %v1028_v59 = vmul.f32 1.442695, %v1027_v53 }
 0x4b3   : > { %v1034_v0 = vpop.permute.xlu1 %1033 }
 0x4b4   : > { %1964 = vpow2.f32 %v1028_v59 }
 0x4b7   : > { %v1162_v4 = vpop.permute.xlu1 %1161 }
 0x4b9   : > { %v1961_v54 = vpop.eup %1960 }
 0x4ba   : > { %v1963_v62 = vpop.eup %1962 }
 0x4bb   : > { %v681_v63 = vmul.f32 %v1963_v62, %v676_v31  ;;  %v1160_v5 = vpop.permute.xlu1 %1159 }
 0x4bd   : > { %v682_v2 = vpack.c.bf16 %v681_v63, %v681_v63  ;;  %v1946_v63 = vld [vmem:[%s2416_s7 + $0x8] sm:$0xff]  }
 0x4bf   : > { %v1249_v7 = vpop.permute.xlu1 %1248 }
 0x4c1   : > { %v1965_v6 = vpop.eup %1964 }
 0x4c2   : > { %v1030_v26 = vsel %vm518_vm2, %v1965_v6, 0.0 }
 0x4e1   : > { %v844_v55 = vpop.f32.mrf.mxu0 }
 0x4e2   : > { %v849_v57 = vmul.f32 %v1961_v54, %v844_v55 }
 0x4e3   : > { %v1819_v58 = vpop.f32.mrf.mxu0 }
 0x4e4   : > { %v850_v60 = vpack.c.bf16 %v849_v57, %v849_v57 }
 0x4e6   : > { %1823 = vmatmul.mubr.msk.bf16.vlgmr.msra.gmra.mxu0 %vm518_vm2, %v850_v60 }
 0x4e7   : > { %1827 = vmatpush3.bf16.msra.mxu0 %v902_v61  ;;  %1828 = vmatprep.mubr.msk.bf16.mxu0 %vm2041_vm0, %v2040_v1 }
 0x4e8   : > { %1837 = vmatprep.subr.mxu0 %v2040_v1 }
 0x4ee   : > { %1829 = vmatmul.mubr.msk.bf16.vlgmr.msra.gmra.mxu0 %vm518_vm2, %v682_v2 }
 0x4ef   : > { %1838 = vmatpush3.msra.mxu0 %v1034_v0  ;;  %1839 = vmatprep.mubr.msk.f32.mxu0 %vm2041_vm0, %v2040_v1 }
 0x4f0   : > { %1848 = vmatprep.subr.mxu0 %v2040_v1 }
 0x4f6   : > { %1840 = vmatmul.mubr.msk.f32.vlgmr.msra.gmra.mxu0 %vm518_vm2, %v1965_v6  ;;  %v1732_v6 = vld [vmem:[%s2414_s5] ss:$0 sm:$0xff] }
 0x4f7   : > { %1849 = vmatpush3.xpose.msk.msra.mxu0 %vm518_vm2, %v1162_v4  ;;  %1850 = vmatprep.mubr.msk.f32.mxu0 %vm2041_vm0, %v2040_v1 }
 0x4f8   : > { %1853 = vmatprep.subr.mxu0 %v2040_v1 }
 0x4fa   : > { %1851 = vmatmul.mubr.msk.f32.vlgmr.msra.gmra.mxu0 %vm518_vm2, %v1160_v5 }
 0x4fb   : > { %1854 = vmatpush3.msra.mxu0 %v1249_v7  ;;  %1855 = vmatprep.mubr.msk.f32.mxu0 %vm2041_vm0, %v2040_v1 }
 0x4fc   : > { %1864 = vmatprep.subr.bf16.mxu0 %v2040_v1 }
 0x5a6   : > { %v892_v8 = vpop.f32.mrf.mxu0 }
 0x5a8   : > { %v1824_v9 = vpop.f32.mrf.mxu0 }
 0x5aa   : > { %v895_v10 = vpop.f32.mrf.mxu0 }
 0x5ac   : > { %v1825_v11 = vpop.f32.mrf.mxu0 }
 0x5ae   : > { %v938_v12 = vpop.f32.mrf.mxu0 }
 0x5af   : > { %v939_v13 = vadd.f32 %v938_v12, %v892_v8  ;;  %v1733_v8 = vld [vmem:[%s2415_s6] ss:$0 sm:$0xff]  ;;  %v1948_v12 = vld [vmem:[%s2418_s9 + $0x38] sm:$0xff]  }
 0x5b0   : > { %v1830_v16 = vpop.f32.mrf.mxu0 }
 0x5b1   : > { %v1950_v16 = vld [vmem:[%s2418_s9 + $0x28] sm:$0xff]  }
 0x5b2   : > { %v941_v17 = vpop.f32.mrf.mxu0 }
 0x5b3   : > { %v1951_v17 = vld [vmem:[%s2418_s9 + $0x20] sm:$0xff]  }
 0x5b4   : > { %v1831_v18 = vpop.f32.mrf.mxu0 }
 0x5b5   : > { %v1952_v18 = vld [vmem:[%s2418_s9 + $0x18] sm:$0xff]  }
 0x5b6   : > { %v1105_v19 = vpop.f32.mrf.mxu0 }
 0x5b8   : > { %v1841_v20 = vpop.f32.mrf.mxu0 }
 0x5b9   : > { %v1954_v20 = vld [vmem:[%s2418_s9 + $0x8] sm:$0xff]  }
 0x5ba   : > { %v1233_v21 = vpop.f32.mrf.mxu0 }
 0x5bb   : > { %v1237_v22 = vmul.f32 0.35355338, %v1233_v21  ;;  %v1955_v21 = vld [vmem:[%s2418_s9] sm:$0xff]  }
 0x5bc   : > { %v1852_v23 = vpop.f32.mrf.mxu0 }
 0x5bd   : > { %v1238_v24 = vsel %vm514_vm3, %v1237_v22, -1e+30  ;;  %v1734_v22 = vld [vmem:[%s2417_s8] ss:$0 sm:$0xff] }
 0x5be   : > { %v1239_v25 = vsel %vm518_vm2, %v1238_v24, -inf }
 0x5bf   : > { %1240 = vmax.xlane.f32.xlu0 %v1239_v25 }
 0x5c3   : > { %1031 = vadd.xlane.f32.xlu0 %v1030_v26 }
 0x648   : > { %v1241_v29 = vpop.xlane.xlu0 %1240 }
 0x649   : > { %v1242_v30 = vsub.f32 %v1238_v24, %v1241_v29 }
 0x64b   : > { %v1243_v31 = vmul.f32 1.442695, %v1242_v30 }
 0x64c   : > { %v1032_v14 = vpop.xlane.xlu0 %1031 }
 0x64d   : > { %1966 = vpow2.f32 %v1243_v31 }
 0x64e   : > { %1968 = vrcp.f32 %v1032_v14 }
 0x65a   : > { %v1967_v15 = vpop.eup %1966 }
 0x65b   : > { %v1969_v32 = vpop.eup %1968  ;;  %1856 = vmatmul.mubr.msk.f32.vlgmr.msra.gmra.mxu0 %vm518_vm2, %v1967_v15  ;;  %v1245_v33 = vsel %vm518_vm2, %v1967_v15, 0.0 }
 0x65c   : > { %1246 = vadd.xlane.f32.xlu1 %v1245_v33  ;;  %v1110_v34 = vmul.f32 %v1969_v32, %v1105_v19  ;;  %1868 = vmatprep.mubr.msk.bf16.mxu0 %vm2041_vm0, %v2040_v1  ;;  %v1953_v19 = vld [vmem:[%s2418_s9 + $0x10] sm:$0xff]  }
 0x65d   : > { %1865 = vmatpush3.bf16.msra.mxu0 %v1946_v63 }
 0x65e   : > { %v1111_v35 = vpack.c.bf16 %v1110_v34, %v1110_v34  ;;  %1866 = vmatprep.subr.bf16.mxu0 %v2040_v1 }
 0x660   : > { %1845 = vmatmul.mubr.msk.bf16.vlgmr.msra.gmra.mxu1 %vm518_vm2, %v1111_v35  ;;  %v1738_v35 = vld [vmem:[%s2419_s10] ss:$0 sm:$0xff] }
 0x661   : > { %1860 = vmatprep.mubr.msk.bf16.mxu1 %vm2041_vm0, %v2040_v1  ;;  %1859 = vmatpush3.bf16.msra.mxu1 %v1331_v37 }
 0x662   : > { %1872 = vmatprep.subr.bf16.mxu1 %v2040_v1 }
 0x6e5   : > { %v1247_v38 = vpop.xlane.xlu1 %1246 }
 0x6e6   : > { %1970 = vrcp.f32 %v1247_v38 }
 0x6f3   : > { %v1971_v39 = vpop.eup %1970 }
 0x71b   : > { %v1320_v40 = vpop.f32.mrf.mxu0 }
 0x71c   : > { %v1325_v41 = vmul.f32 %v1971_v39, %v1320_v40 }
 0x71d   : > { %v1857_v42 = vpop.f32.mrf.mxu0 }
 0x71e   : > { %v1326_v43 = vpack.c.bf16 %v1325_v41, %v1325_v41 }
 0x720   : > { %v1152_v44 = vpop.f32.mrf.mxu1  ;;  %1861 = vmatmul.mubr.msk.bf16.vlgmr.msra.gmra.mxu1 %vm518_vm2, %v1326_v43 }
 0x721   : > { %v1158_v45 = vadd.f32 %v1152_v44, %v939_v13  ;;  %1888 = vmatprep.mubr.msk.bf16.mxu1 %vm2041_vm0, %v2040_v1  ;;  %1873 = vmatpush3.bf16.msra.mxu1 %v1948_v12  ;;  %v1949_v13 = vld [vmem:[%s2418_s9 + $0x30] sm:$0xff]  }
 0x722   : > { %v1846_v46 = vpop.f32.mrf.mxu1  ;;  %1874 = vmatprep.subr.bf16.mxu1 %v2040_v1 }
 0x724   : > { %v1155_v47 = vpop.f32.mrf.mxu1 }
 0x725   : > { %1875 = vmatpush3.bf16.msra.mxu1 %v1949_v13 }
 0x726   : > { %v1847_v48 = vpop.f32.mrf.mxu1  ;;  %1876 = vmatprep.subr.bf16.mxu1 %v2040_v1 }
 0x729   : > { %1877 = vmatpush3.bf16.msra.mxu1 %v1950_v16 }
 0x72a   : > { %1878 = vmatprep.subr.bf16.mxu1 %v2040_v1 }
 0x72d   : > { %1879 = vmatpush3.bf16.msra.mxu1 %v1951_v17 }
 0x72e   : > { %1880 = vmatprep.subr.bf16.mxu1 %v2040_v1 }
 0x731   : > { %1881 = vmatpush3.bf16.msra.mxu1 %v1952_v18 }
 0x732   : > { %1882 = vmatprep.subr.bf16.mxu1 %v2040_v1 }
 0x735   : > { %1883 = vmatpush3.bf16.msra.mxu1 %v1953_v19 }
 0x736   : > { %1884 = vmatprep.subr.bf16.mxu1 %v2040_v1 }
 0x739   : > { %1885 = vmatpush3.bf16.msra.mxu1 %v1954_v20 }
 0x73a   : > { %1886 = vmatprep.subr.bf16.mxu1 %v2040_v1 }
 0x73d   : > { %1887 = vmatpush3.bf16.msra.mxu1 %v1955_v21 }
 0x7e0   : > { %v1367_v49 = vpop.f32.mrf.mxu1 }
 0x7e1   : > { %v1373_v51 = vadd.f32 %v1367_v49, %v1158_v45 }
 0x7e2   : > { %v1862_v52 = vpop.f32.mrf.mxu1 }
 0x7e3   : > { %v1381_v53 = vadd.f32 %v1731_v50, %v1373_v51  ;;  %v1747_v52 = vld [vmem:[%s2420_s11] ss:$0 sm:$0xff] }
 0x7e4   : > { %v1370_v54 = vpop.f32.mrf.mxu1 }
 0x7e5   : > { %v1382_v55 = vadd.f32 %v1381_v53, %v2191_v3  ;;  %v1947_v3 = vld [vmem:[%s2416_s7] sm:$0xff]  }
 0x7e6   : > { %v1863_v56 = vpop.f32.mrf.mxu1  ;;  %1867 = vmatpush3.bf16.msra.mxu0 %v1947_v3  ;;  %v1748_v54 = vld [vmem:[%s2421_s12] ss:$0 sm:$0xff] }
 0x7e7   : > { %v1385_v57 = vsel %vm462_vm1, %v1382_v55, 0.0 }
 0x7e8   : > { %1386 = vadd.xlane.f32.xlu0 %v1385_v57 }
 0x871   : > { %v1387_v58 = vpop.xlane.xlu0 %1386 }
 0x872   : > { %v1389_v59 = vmul.f32 0.03125, %v1387_v58 }
 0x874   : > { %v1390_v60 = vsub.f32 %v1382_v55, %v1389_v59 }
 0x876   : > { %v1391_v61 = vmul.f32 %v1390_v60, %v1390_v60 }
 0x878   : > { %v1392_v62 = vsel %vm462_vm1, %v1391_v61, 0.0 }
 0x879   : > { %1393 = vadd.xlane.f32.xlu0 %v1392_v62 }
 0x902   : > { %v1394_v0 = vpop.xlane.xlu0 %1393 }
 0x903   : > { %v1395_v2 = vmul.f32 0.03125, %v1394_v0 }
 0x905   : > { %v1396_v4 = vadd.f32 1e-05, %v1395_v2 }
 0x907   : > { %1972 = vrsqrt.f32 %v1396_v4 }
 0x914   : > { %v1973_v5 = vpop.eup %1972 }
 0x915   : > { %v1398_v7 = vmul.f32 %v1973_v5, %v1390_v60 }
 0x917   : > { %v1405_v9 = vmul.f32 %v1732_v6, %v1398_v7 }
 0x919   : > { %v1412_v10 = vadd.f32 %v1733_v8, %v1405_v9 }
 0x91b   : > { %v1413_v11 = vpack.c.bf16 %v1412_v10, %v1412_v10 }
 0x91d   : > { %1869 = vmatmul.mubr.msk.bf16.vlgmr.msra.gmra.mxu0 %vm462_vm1, %v1413_v11 }
 0x9dd   : > { %v1474_v23 = vpop.f32.mrf.mxu0 }
 0x9de   : > { %v1475_v24 = vadd.f32 %v1734_v22, %v1474_v23 }
 0x9df   : > { %v1870_v25 = vpop.f32.mrf.mxu0 }
 0x9e0   : > { %v1481_v26 = vmul.f32 0.044715, %v1475_v24  ;;  %v1480_v32 = vmul.f32 0.5, %v1475_v24 }
 0x9e1   : > { %v1477_v27 = vpop.f32.mrf.mxu0 }
 0x9e2   : > { %v1482_v28 = vmul.f32 %v1481_v26, %v1475_v24 }
 0x9e3   : > { %v1871_v29 = vpop.f32.mrf.mxu0 }
 0x9e4   : > { %v1483_v30 = vmul.f32 %v1482_v28, %v1475_v24 }
 0x9e6   : > { %v1484_v31 = vadd.f32 %v1483_v30, %v1475_v24 }
 0x9e8   : > { %v1485_v14 = vmul.f32 0.7978846, %v1484_v31 }
 0x9ea   : > { %1974 = vtanh.f32 %v1485_v14 }
 0x9f7   : > { %v1975_v15 = vpop.eup %1974 }
 0x9f8   : > { %v1487_v33 = vadd.f32 1.0, %v1975_v15 }
 0x9fa   : > { %v1488_v1 = vmul.f32 %v1487_v33, %v1480_v32 }
 0x9fc   : > { %v1489_v34 = vpack.c.bf16 %v1488_v1, %v1488_v1 }
 0x9fe   : > { %1889 = vmatmul.mubr.bf16.vlgmr.msra.gmra.mxu1 %v1489_v34 }
 0xabe   : > { %v1595_v36 = vpop.f32.mrf.mxu1 }
 0xabf   : > { %v1596_v37 = vadd.f32 %v1738_v35, %v1595_v36 }
 0xac0   : > { %v1890_v38 = vpop.f32.mrf.mxu1 }
 0xac1   : > { %v1601_v39 = vadd.f32 %v1596_v37, %v1412_v10 }
 0xac2   : > { %v1598_v40 = vpop.f32.mrf.mxu1 }
 0xac3   : > { %v1604_v41 = vsel %vm462_vm1, %v1601_v39, 0.0 }
 0xac4   : > { %1605 = vadd.xlane.f32.xlu0 %v1604_v41  ;;  %v1891_v42 = vpop.f32.mrf.mxu1 }
 0xb4d   : > { %v1606_v43 = vpop.xlane.xlu0 %1605 }
 0xb4e   : > { %v1607_v44 = vmul.f32 0.03125, %v1606_v43 }
 0xb50   : > { %v1608_v45 = vsub.f32 %v1601_v39, %v1607_v44 }
 0xb52   : > { %v1609_v46 = vmul.f32 %v1608_v45, %v1608_v45 }
 0xb54   : > { %v1610_v47 = vsel %vm462_vm1, %v1609_v46, 0.0 }
 0xb55   : > { %1611 = vadd.xlane.f32.xlu0 %v1610_v47 }
 0xbde   : > { %v1612_v48 = vpop.xlane.xlu0 %1611 }
 0xbdf   : > { %v1613_v49 = vmul.f32 0.03125, %v1612_v48 }
 0xbe1   : > { %v1614_v50 = vadd.f32 1e-05, %v1613_v49 }
 0xbe3   : > { %1976 = vrsqrt.f32 %v1614_v50 }
 0xbf0   : > { %v1977_v51 = vpop.eup %1976 }
 0xbf1   : > { %v1616_v53 = vmul.f32 %v1977_v51, %v1608_v45 }
 0xbf3   : > { %v1623_v55 = vmul.f32 %v1747_v52, %v1616_v53 }
 0xbf5   : > { %v1630_v56 = vadd.f32 %v1748_v54, %v1623_v55 }
 0xbf7   : > { %1631 = vst.msk [vmem:[%s431_s23] sm:$0xff] %vm462_vm1, %v1630_v56 }
 0xbf8   : > { %1991 = shalt.err (!%p1988_p3)
}
 0xbf9   : > { %s1992_s1 = scalar_lea.hbm %s1644_s3, 128  ;;  %s1996_s30 = scalar_lea.hbm %s2422_s13, 256 }
 0xbfa   : > { %p1993_p4 = scmp.ne.s32.totalorder %s1644_s3, %s1992_s1  ;;  %p1997_p9 = scmp.lt.s32.totalorder %s1644_s3, %s2422_s13 }
 0xbfb   : > { %p1998_p10 = scmp.lt.s32.totalorder %s1996_s30, %s1992_s1 }
 0xbfc   : > { %p1994_p7 = pnand %p1993_p4, %p2162_p5 }
 0xbfd   : > { %p1999_p11 = por %p1998_p10, %p1997_p9 }
 0xbfe   : > { %p1995_p8 = pneg %p1994_p7 }
 0xc00   : > { %p2000_p12 = pnand %p1999_p11, %p1995_p8 }
 0xc02   : > { %2003 = shalt.err (!%p2000_p12)
}
 0xc03   : > { %1892 = dma.vmem_to_hbm [thread:$0]  (%p2162_p5), %s1647_s0, 128, %s1644_s3, %s1633_s4  }
 0xc04 PF: > { %p1898_p13 = scmp.ge.s32.totalorder %s2038_s28, 2  ;;  %s1658_s23 = sand.u32 1, %s2026_s25  }
 0xc05   : > { %s1659_s15 = scalar_lea.sflag [#allocation3], %s1658_s23 }
 0xc06   : > { %p1895_p0 = pnand %p1898_p13, %p2166_p6 }
 0xc08   : > { %p1896_p1 = pneg %p1895_p0 }
 0xc0a   : > { %2021 = dma.done.wait (%p1896_p1), %s1659_s15, 128  }
 0xc0b   : > { %2023 = vsyncadd (%p1896_p1), %s1659_s15, 4294967168  ;;  %p23_p2 = scmp.ge.s32.totalorder %s2149_s14, 4   ;;  %s2435_s25 = smov %s2030_s26 }
 0xc0c   : > { %s2436_s26 = smov %s2034_s27  ;;  %s2437_s27 = smov %s2160_s17 }
 0xc0d   : > { %s2438_s28 = smov %s2149_s14  ;;  %25 = sbr.rel (!%p23_p2) target bundleno = 9 (0x9), region = 107 }
 0xc12   :  { %1664 = vsyncpa [#allocation3], 1 }
 0xc13   :  { %1666 = vsyncpa [#allocation3 + $0x1], 1 }

</bundles_post_ra>
